<compile_context>
chip_gen: v7x
topology: tpu7x:2x2x1
jax: 0.10.0
libtpu: 0.0.40
codegen_flags: <defaults>
</compile_context>

<pallas_src>
import math
from functools import partial

import jax
import jax.numpy as jnp
from jax.experimental import pallas as pl
from jax.experimental.pallas import tpu as pltpu


# ----------------------------- Pallas kernel ------------------------------- #

def fused_forward_kernel(h_ref, pe_ref, gamma_ref, beta_ref, w_ref, b_ref, o_ref,
                         *, scale, eps):
    """o = log_softmax( LayerNorm(h * scale + pe) @ W + b , axis=-1)

    h_ref, pe_ref, gamma_ref, beta_ref : [TM, D]
    w_ref                              : [D, C_pad]   (C padded to 128 lanes)
    b_ref                              : [1, C_pad]   (padded columns = -1e30)
    o_ref                              : [TM, C_pad]
    """
    # embedding scale + positional-encoding add
    x = h_ref[...] * scale + pe_ref[...]                           # [TM, D]

    # LayerNorm (biased variance, eps=1e-5) — matches torch.nn.LayerNorm
    mean = jnp.mean(x, axis=-1, keepdims=True)
    xc = x - mean
    var = jnp.mean(xc * xc, axis=-1, keepdims=True)
    inv = jax.lax.rsqrt(var + eps)
    xn = xc * inv * gamma_ref[...] + beta_ref[...]                 # [TM, D]

    # Generator: Linear + log_softmax (padded columns already at -1e30 via bias)
    logits = jnp.dot(xn, w_ref[...],
                     preferred_element_type=jnp.float32) + b_ref[...]   # [TM, C_pad]
    m = jnp.max(logits, axis=-1, keepdims=True)
    shifted = logits - m
    lse = jnp.log(jnp.sum(jnp.exp(shifted), axis=-1, keepdims=True))
    o_ref[...] = shifted - lse


# ------------------------------ wrapper ------------------------------------ #

def _round_up(x, m):
    return ((x + m - 1) // m) * m


def fused_embed_norm_generator(h_r, pe_r, gamma, beta, w_t, b, *, scale, n_classes):
    """h_r, pe_r: [R, D]; w_t: [D, C]; b: [C].  Returns [R, C] log-probs."""
    r, d = h_r.shape
    c = n_classes

    # --- row tiling: multiple of 8 sublanes, capped at 256 rows per tile ---
    r8 = _round_up(max(r, 1), 8)
    tm = min(r8, 256)
    r_pad = _round_up(r, tm)
    if r_pad != r:
        pad = r_pad - r
        h_r = jnp.pad(h_r, ((0, pad), (0, 0)))
        pe_r = jnp.pad(pe_r, ((0, pad), (0, 0)))

    # --- lane-dense output: pad classes to a multiple of 128 ---
    c_pad = _round_up(c, 128)
    big_neg = jnp.float32(-1e30)
    w_pad = jnp.zeros((d, c_pad), jnp.float32).at[:, :c].set(w_t.astype(jnp.float32))
    b_pad = jnp.full((1, c_pad), big_neg, jnp.float32).at[0, :c].set(b.astype(jnp.float32))

    # --- pre-broadcast LayerNorm affine params to the tile height (VMEM-resident) ---
    gamma_t = jnp.broadcast_to(gamma.reshape(1, d).astype(jnp.float32), (tm, d))
    beta_t = jnp.broadcast_to(beta.reshape(1, d).astype(jnp.float32), (tm, d))

    grid = (r_pad // tm,)
    out = pl.pallas_call(
        partial(fused_forward_kernel, scale=float(scale), eps=1e-5),
        out_shape=jax.ShapeDtypeStruct((r_pad, c_pad), jnp.float32),
        grid=grid,
        in_specs=[
            pl.BlockSpec((tm, d), lambda i: (i, 0)),        # h rows   (tiled)
            pl.BlockSpec((tm, d), lambda i: (i, 0)),        # pe rows  (tiled)
            pl.BlockSpec((tm, d), lambda i: (0, 0)),        # gamma    (resident)
            pl.BlockSpec((tm, d), lambda i: (0, 0)),        # beta     (resident)
            pl.BlockSpec((d, c_pad), lambda i: (0, 0)),     # W        (resident)
            pl.BlockSpec((1, c_pad), lambda i: (0, 0)),     # b        (resident)
        ],
        out_specs=pl.BlockSpec((tm, c_pad), lambda i: (i, 0)),
        compiler_params=pltpu.CompilerParams(
            dimension_semantics=("parallel",)),
    )(h_r, pe_r, gamma_t, beta_t, w_pad, b_pad)

    return out[:r, :c]


# --------------------------- model forward (glue) --------------------------- #

def positional_encoding(pos, dim_model):
    """Standard sinusoidal PE (interleaved sin/cos), pos: [N] int32 -> [N, D] f32."""
    assert dim_model % 2 == 0, "dim_model must be even for sinusoidal PE"
    posf = pos.astype(jnp.float32)[:, None]                        # [N, 1]
    i = jnp.arange(0, dim_model, 2, dtype=jnp.float32)             # [D/2]
    div = jnp.exp(-i * (math.log(10000.0) / dim_model))            # [D/2]
    ang = posf * div[None, :]                                      # [N, D/2]
    # interleave sin/cos via stack+reshape (no strided scatter stores)
    pe = jnp.stack([jnp.sin(ang), jnp.cos(ang)], axis=-1)          # [N, D/2, 2]
    return pe.reshape(pos.shape[0], dim_model)                     # [N, D]


def segment_tree_transformer_forward(params, tokens, positions, readout_ids):
    dim_model = params["embed"].shape[1]
    n_classes = params["gen_b"].shape[0]

    # TODO(synk): n_layers x SparseSelfAttention (DGL message passing) not translated
    # (identity on node features).  Because of that, only readout rows influence the
    # output, so the readout gather is hoisted onto the small index vectors here.
    tok_r = jnp.take(tokens, readout_ids, axis=0)                  # [R]
    pos_r = jnp.take(positions, readout_ids, axis=0)               # [R]

    # Embedding(vocab, dim_embed, scale=True) lookup; sqrt(D) scale applied in-kernel.
    h_r = jnp.take(params["embed"], tok_r, axis=0)                 # [R, D]
    pe_r = positional_encoding(pos_r, dim_model)                   # [R, D]

    # Fused Pallas kernel: scale + PE add + LayerNorm + Linear + log_softmax.
    # (emb_dropout / cls_dropout are identity at eval.)
    out = fused_embed_norm_generator(
        h_r, pe_r, params["ln_gamma"], params["ln_beta"],
        params["gen_w_t"], params["gen_b"],
        scale=math.sqrt(dim_model), n_classes=n_classes)
    return out


# --------------------------------- main ------------------------------------ #

if __name__ == "__main__":
    vocab_size = 50
    dim_model = 32       # dim_embed == dim_model -> embed_to_hidden is None
    n_classes = 10
    n_leaf = 16
    n_readout = 8

    key = jax.random.PRNGKey(0)
    k_emb, k_g, k_b, k_w, k_tok, k_pos = jax.random.split(key, 6)

    params = {
        "embed":    jax.random.normal(k_emb, (vocab_size, dim_model), jnp.float32) * 0.02,
        "ln_gamma": jnp.ones((dim_model,), jnp.float32),
        "ln_beta":  jnp.zeros((dim_model,), jnp.float32),
        # nn.Linear(dim_model, n_classes): weight [C, D]; store transposed [D, C]
        "gen_w_t":  (jax.random.normal(k_w, (n_classes, dim_model), jnp.float32)
                     * (1.0 / math.sqrt(dim_model))).T,
        "gen_b":    jax.random.normal(k_b, (n_classes,), jnp.float32) * 0.01,
    }

    tokens = jax.random.randint(k_tok, (n_leaf,), 0, vocab_size, dtype=jnp.int32)
    positions = jnp.arange(n_leaf, dtype=jnp.int32)
    readout_ids = jnp.arange(n_readout, dtype=jnp.int32)

    fwd = jax.jit(segment_tree_transformer_forward)
    out = fwd(params, tokens, positions, readout_ids)
    out = jax.block_until_ready(out)

    assert out.shape == (n_readout, n_classes)
    # rows of log_softmax must exp-sum to 1
    assert bool(jnp.allclose(jnp.exp(out).sum(-1), 1.0, atol=1e-4))
    print("KERNEL_OK")
</pallas_src>

<mosaic_0001>
module attributes {stable_mosaic.version = 11 : i64} {
  func.func @fused_forward_kernel(%arg0: i32, %arg1: memref<8x32xf32, #tpu.memory_space<vmem>>, %arg2: memref<8x32xf32, #tpu.memory_space<vmem>>, %arg3: memref<8x32xf32, #tpu.memory_space<vmem>>, %arg4: memref<8x32xf32, #tpu.memory_space<vmem>>, %arg5: memref<32x128xf32, #tpu.memory_space<vmem>>, %arg6: memref<1x128xf32, #tpu.memory_space<vmem>>, %arg7: memref<8x128xf32, #tpu.memory_space<vmem>>) attributes {dimension_semantics = [#tpu.dimension_semantics<parallel>], iteration_bounds = array<i64: 1>, scalar_prefetch = 0 : i64, scratch_operands = 0 : i64, tpu.core_type = #tpu.core_type<tc>, window_params = [{transform_indices = @transform_0, window_bounds = array<i64: 8, 32>}, {transform_indices = @transform_1, window_bounds = array<i64: 8, 32>}, {pipeline_mode = #tpu.pipeline_mode<synchronous>, transform_indices = @transform_2, window_bounds = array<i64: 8, 32>}, {pipeline_mode = #tpu.pipeline_mode<synchronous>, transform_indices = @transform_3, window_bounds = array<i64: 8, 32>}, {pipeline_mode = #tpu.pipeline_mode<synchronous>, transform_indices = @transform_4, window_bounds = array<i64: 32, 128>}, {pipeline_mode = #tpu.pipeline_mode<synchronous>, transform_indices = @transform_5, window_bounds = array<i64: 1, 128>}, {transform_indices = @transform_6, window_bounds = array<i64: 8, 128>}]} {
    %c0 = arith.constant 0 : index
    %c0_0 = arith.constant 0 : index
    %0 = vector.load %arg1[%c0, %c0_0] : memref<8x32xf32, #tpu.memory_space<vmem>>, vector<8x32xf32>
    %cst = arith.constant 5.65685415 : f32
    %1 = vector.broadcast %cst : f32 to vector<8x32xf32>
    %2 = arith.mulf %0, %1 : vector<8x32xf32>
    %c0_1 = arith.constant 0 : index
    %c0_2 = arith.constant 0 : index
    %3 = vector.load %arg2[%c0_1, %c0_2] : memref<8x32xf32, #tpu.memory_space<vmem>>, vector<8x32xf32>
    %4 = arith.addf %2, %3 : vector<8x32xf32>
    %cst_3 = arith.constant dense<0.000000e+00> : vector<8xf32>
    %5 = vector.multi_reduction <add>, %4, %cst_3 [1] : vector<8x32xf32> to vector<8xf32>
    %6 = vector.shape_cast %5 : vector<8xf32> to vector<8x1xf32>
    %cst_4 = arith.constant 3.200000e+01 : f32
    %7 = vector.broadcast %cst_4 : f32 to vector<8x1xf32>
    %8 = arith.divf %6, %7 : vector<8x1xf32>
    %9 = vector.broadcast %8 : vector<8x1xf32> to vector<8x32xf32>
    %10 = arith.subf %4, %9 : vector<8x32xf32>
    %11 = arith.mulf %10, %10 : vector<8x32xf32>
    %cst_5 = arith.constant dense<0.000000e+00> : vector<8xf32>
    %12 = vector.multi_reduction <add>, %11, %cst_5 [1] : vector<8x32xf32> to vector<8xf32>
    %13 = vector.shape_cast %12 : vector<8xf32> to vector<8x1xf32>
    %cst_6 = arith.constant 3.200000e+01 : f32
    %14 = vector.broadcast %cst_6 : f32 to vector<8x1xf32>
    %15 = arith.divf %13, %14 : vector<8x1xf32>
    %cst_7 = arith.constant 9.99999974E-6 : f32
    %16 = vector.broadcast %cst_7 : f32 to vector<8x1xf32>
    %17 = arith.addf %15, %16 : vector<8x1xf32>
    %18 = math.rsqrt %17 : vector<8x1xf32>
    %19 = vector.broadcast %18 : vector<8x1xf32> to vector<8x32xf32>
    %20 = arith.mulf %10, %19 : vector<8x32xf32>
    %c0_8 = arith.constant 0 : index
    %c0_9 = arith.constant 0 : index
    %21 = vector.load %arg3[%c0_8, %c0_9] : memref<8x32xf32, #tpu.memory_space<vmem>>, vector<8x32xf32>
    %22 = arith.mulf %20, %21 : vector<8x32xf32>
    %c0_10 = arith.constant 0 : index
    %c0_11 = arith.constant 0 : index
    %23 = vector.load %arg4[%c0_10, %c0_11] : memref<8x32xf32, #tpu.memory_space<vmem>>, vector<8x32xf32>
    %24 = arith.addf %22, %23 : vector<8x32xf32>
    %c0_12 = arith.constant 0 : index
    %c0_13 = arith.constant 0 : index
    %25 = vector.load %arg5[%c0_12, %c0_13] : memref<32x128xf32, #tpu.memory_space<vmem>>, vector<32x128xf32>
    %cst_14 = arith.constant dense<0.000000e+00> : vector<8x128xf32>
    %26 = tpu.matmul %24, %25, %cst_14 {dimension_numbers = #tpu.dot_dimension_numbers<[1], [0], [0], [1], [0, 0, 1, 1], [], []>} : vector<8x32xf32>, vector<32x128xf32>, vector<8x128xf32> -> vector<8x128xf32>
    %c0_15 = arith.constant 0 : index
    %c0_16 = arith.constant 0 : index
    %27 = vector.load %arg6[%c0_15, %c0_16] : memref<1x128xf32, #tpu.memory_space<vmem>>, vector<1x128xf32>
    %28 = vector.broadcast %27 : vector<1x128xf32> to vector<8x128xf32>
    %29 = arith.addf %26, %28 : vector<8x128xf32>
    %cst_17 = arith.constant dense<0xFF800000> : vector<8xf32>
    %30 = vector.multi_reduction <maximumf>, %29, %cst_17 [1] : vector<8x128xf32> to vector<8xf32>
    %31 = vector.shape_cast %30 : vector<8xf32> to vector<8x1xf32>
    %32 = vector.broadcast %31 : vector<8x1xf32> to vector<8x128xf32>
    %33 = arith.subf %29, %32 : vector<8x128xf32>
    %34 = math.exp %33 : vector<8x128xf32>
    %cst_18 = arith.constant dense<0.000000e+00> : vector<8xf32>
    %35 = vector.multi_reduction <add>, %34, %cst_18 [1] : vector<8x128xf32> to vector<8xf32>
    %36 = vector.shape_cast %35 : vector<8xf32> to vector<8x1xf32>
    %37 = math.log %36 : vector<8x1xf32>
    %38 = vector.broadcast %37 : vector<8x1xf32> to vector<8x128xf32>
    %39 = arith.subf %33, %38 : vector<8x128xf32>
    %c0_19 = arith.constant 0 : index
    %c0_20 = arith.constant 0 : index
    %40 = vector.load %arg7[%c0_19, %c0_20] : memref<8x128xf32, #tpu.memory_space<vmem>>, vector<8x128xf32>
    tpu.vector_store %arg7[%c0_19, %c0_20], %39 {strides = array<i32>} : memref<8x128xf32, #tpu.memory_space<vmem>>, vector<8x128xf32>,
    return
  }
  func.func @transform_0(%arg0: i32) -> (i32, i32) {
    %c0_i32 = arith.constant 0 : i32
    %c0_i32_0 = arith.constant 0 : i32
    return %arg0, %c0_i32 : i32, i32
  }
  func.func @transform_1(%arg0: i32) -> (i32, i32) {
    %c0_i32 = arith.constant 0 : i32
    %c0_i32_0 = arith.constant 0 : i32
    return %arg0, %c0_i32 : i32, i32
  }
  func.func @transform_2(%arg0: i32) -> (i32, i32) {
    %c0_i32 = arith.constant 0 : i32
    %c0_i32_0 = arith.constant 0 : i32
    %c0_i32_1 = arith.constant 0 : i32
    return %c0_i32, %c0_i32_0 : i32, i32
  }
  func.func @transform_3(%arg0: i32) -> (i32, i32) {
    %c0_i32 = arith.constant 0 : i32
    %c0_i32_0 = arith.constant 0 : i32
    %c0_i32_1 = arith.constant 0 : i32
    return %c0_i32, %c0_i32_0 : i32, i32
  }
  func.func @transform_4(%arg0: i32) -> (i32, i32) {
    %c0_i32 = arith.constant 0 : i32
    %c0_i32_0 = arith.constant 0 : i32
    %c0_i32_1 = arith.constant 0 : i32
    return %c0_i32, %c0_i32_0 : i32, i32
  }
  func.func @transform_5(%arg0: i32) -> (i32, i32) {
    %c0_i32 = arith.constant 0 : i32
    %c0_i32_0 = arith.constant 0 : i32
    %c0_i32_1 = arith.constant 0 : i32
    return %c0_i32, %c0_i32_0 : i32, i32
  }
  func.func @transform_6(%arg0: i32) -> (i32, i32) {
    %c0_i32 = arith.constant 0 : i32
    %c0_i32_0 = arith.constant 0 : i32
    return %arg0, %c0_i32 : i32, i32
  }
}

</mosaic_0001>

<bundles_post_ra>
// kernel: segment_tree_transformer_forward.1
= control target key start
LH: loop header
LB: loop body
LE: loop exit
PB: predicated region body
PF: predicated region fallthrough
CT: control target
= control target key end

     0   :  { %s295_s0 = inlined_call_operand.vmem [shape: f32[8,32], index: 0, kind: input, shape index: {}]   ;;  %s296_s1 = inlined_call_operand.vmem [shape: f32[8,32], index: 1, kind: input, shape index: {}]   ;;  %s297_s2 = inlined_call_operand.vmem [shape: f32[8,32], index: 2, kind: input, shape index: {}]   ;;  %s298_s3 = inlined_call_operand.vmem [shape: f32[8,32], index: 3, kind: input, shape index: {}]   ;;  %s299_s4 = inlined_call_operand.vmem [shape: f32[32,128], index: 4, kind: input, shape index: {}]   ;;  %s300_s5 = inlined_call_operand.vmem [shape: f32[1,128], index: 5, kind: input, shape index: {}]   ;;  %s301_s6 = inlined_call_operand.hbm [shape: f32[8,128], index: 6, kind: output, shape index: {}]  }
   0x1   :  { %v24_v0 = vld [vmem:[%s295_s0] sm:$0xff] }
   0x2   :  { %v26_v1 = vld [vmem:[%s296_s1] sm:$0xff] }
   0x3   :  { %11 = vsyncpa [#allocation3], 0  ;;  %v25_v2 = vmul.f32 5.656854, %v24_v0  ;;  %vm28_vm0 = vcmask 261120   ;;  %v47_v10 = vld [vmem:[%s299_s4] sm:$0xff] }
   0x4   :  { %v48_v11 = vld [vmem:[%s299_s4 + $0x8] sm:$0xff]  ;;  %v49_v12 = vld [vmem:[%s299_s4 + $0x10] sm:$0xff]  ;;  %v214_v13 = vmov 0.0|0.0   ;;  %v50_v15 = vld [vmem:[%s299_s4 + $0x18] sm:$0xff]  ;;  %vm215_vm1 = vmmov 0   ;;  %v216_v16 = vmov 0.0  }
   0x5   :  { %v27_v3 = vadd.f32 %v26_v1, %v25_v2  ;;  %174 = vmatprep.subr.bf16.mxu0 %v214_v13  ;;  %v175_v14 = vpack.c.bf16 %v48_v11, %v47_v10  ;;  %171 = vmatprep.mubr.msk.f32.mxu0 %vm215_vm1, %v216_v16  ;;  %v178_v17 = vpack.c.bf16 %v50_v15, %v49_v12  ;;  %v43_v22 = vld [vmem:[%s297_s2] sm:$0xff]  ;;  %s217_s2 = smov [#allocation2]  }
   0x6   :  { %v45_v24 = vld [vmem:[%s298_s3] sm:$0xff]  ;;  %s148_s3 = sshll.u32 %s217_s2, 4  ;;  %s149_s3 = int_to_ptr.vmem [resolvable:$true] %s148_s3 }
   0x7   :  { %v29_v4 = vsel %vm28_vm0, %v27_v3, 0.0  ;;  %176 = vmatpush3.bf16.msra.mxu0 %v175_v14  ;;  %v156_v27 = vld [vmem:[%s300_s5] ss:$0 sm:$0xff]  ;;  %s190_s5 = scalar_lea.vmem %s149_s3, 128  ;;  %p195_p1 = scmp.lt.s32.totalorder %s149_s3, %s149_s3 }
   0x8   :  { %30 = vadd.xlane.f32.xlu0 %v29_v4  ;;  %177 = vmatprep.subr.bf16.mxu0 %v214_v13  ;;  %p191_p0 = scmp.ne.s32.totalorder %s149_s3, %s190_s5  ;;  %p196_p2 = scmp.lt.s32.totalorder %s190_s5, %s190_s5 }
   0xa   :  { %p197_p3 = por %p196_p2, %p195_p1 }
   0xb   :  { %179 = vmatpush3.bf16.msra.mxu0 %v178_v17 }
   0xc   :  { %p198_p4 = pnand %p197_p3, %p191_p0 }
  0x95   :  { %v31_v5 = vpop.xlane.xlu0 %30 }
  0x96   :  { %v33_v6 = vmul.f32 0.03125, %v31_v5 }
  0x98   :  { %v34_v7 = vsub.f32 %v27_v3, %v33_v6 }
  0x9a   :  { %v35_v8 = vmul.f32 %v34_v7, %v34_v7 }
  0x9c   :  { %v36_v9 = vsel %vm28_vm0, %v35_v8, 0.0 }
  0x9d   :  { %37 = vadd.xlane.f32.xlu0 %v36_v9 }
 0x12a   :  { %v38_v18 = vpop.xlane.xlu0 %37 }
 0x12b   :  { %v39_v19 = vmul.f32 0.03125, %v38_v18 }
 0x12d   :  { %v40_v20 = vadd.f32 1e-05, %v39_v19 }
 0x12f   :  { %184 = vrsqrt.f32 %v40_v20 }
 0x139   :  { %v185_v21 = vpop.eup %184 }
 0x13a   :  { %v42_v23 = vmul.f32 %v185_v21, %v34_v7 }
 0x13c   :  { %v44_v25 = vmul.f32 %v43_v22, %v42_v23 }
 0x13e   :  { %v46_v26 = vadd.f32 %v45_v24, %v44_v25 }
 0x140   :  { %172 = vmatmul.mubr.msk.f32.vlgmr.msra.gmra.mrb[0].mxu0 %vm28_vm0, %v46_v26 }
 0x213   :  { %v127_v28 = vpop.f32.mrb[0].mxu0 }
 0x214   :  { %v128_v29 = vadd.f32 %v156_v27, %v127_v28  ;;  %v173_v30 = vpop.f32.mrb[1].mxu0 }
 0x216   :  { %131 = vmax.xlane.f32.xlu1 %v128_v29 }
 0x2a3   :  { %v132_v31 = vpop.xlane.xlu1 %131 }
 0x2a4   :  { %v133_v32 = vsub.f32 %v128_v29, %v132_v31 }
 0x2a6   :  { %v134_v33 = vmul.f32 1.442695, %v133_v32 }
 0x2a8   :  { %186 = vpow2.f32 %v134_v33 }
 0x2b2   :  { %v187_v34 = vpop.eup %186 }
 0x2b3   :  { %136 = vadd.xlane.f32.xlu1 %v187_v34 }
 0x340   :  { %v137_v35 = vpop.xlane.xlu1 %136 }
 0x341   :  { %188 = vlog2.f32 %v137_v35 }
 0x34b   :  { %v189_v36 = vpop.eup %188 }
 0x34c   :  { %v139_v37 = vmul.f32 0.6931472, %v189_v36 }
 0x34e   :  { %v140_v38 = vsub.f32 %v133_v32, %v139_v37 }
 0x350   :  { %141 = vst [vmem:[#allocation2] sm:$0xff] %v140_v38 }
 0x351   :  { %201 = shalt.err (!%p198_p4)
}
 0x352   :  { %s202_s14 = scalar_lea.hbm %s301_s6, 128 }
 0x353   :  { %p203_p5 = scmp.ne.s32.totalorder %s301_s6, %s202_s14  ;;  %p206_p6 = scmp.lt.u32.totalorder %s202_s14, %s301_s6 }
 0x355   :  { %p208_p7 = pnand %p206_p6, %p203_p5 }
 0x357   :  { %211 = shalt.err (!%p208_p7)
}
 0x358   :  { %151 = dma.vmem_to_hbm [thread:$0]  %s149_s3, 128, %s301_s6, [#allocation3]  }
 0x359   :  { %212 = dma.done.wait [#allocation3], 128  }
 0x35a   :  { %213 = vsyncadd [#allocation3], 4294967168 }
 0x35b   :  { %155 = vsyncpa [#allocation3], 1 }

</bundles_post_ra>
